<compile_context>
chip_gen: v7x
topology: tpu7x:2x2x1
jax: 0.10.0
libtpu: 0.0.40
codegen_flags: <defaults>
</compile_context>

<pallas_src>
import functools

import jax
import jax.numpy as jnp
from jax import lax
from jax.experimental import pallas as pl
from jax.experimental.pallas import tpu as pltpu


def _mha_kernel(*refs, n_head, d_k, d_v, inv_temperature, eps, has_mask):
    """One (batch, q-tile) grid cell.

    refs (in order):
      q_ref    : (1, TQ, d_model) f32   query rows (also the residual)
      k_ref    : (1, Lk, d_model) bf16
      v_ref    : (1, Lv, d_model) bf16
      wq_ref   : (d_model, H*d_k) bf16  w_qs.weight.T
      wk_ref   : (d_model, H*d_k) bf16  w_ks.weight.T
      wv_ref   : (d_model, H*d_v) bf16  w_vs.weight.T
      wfc_ref  : (H*d_v, d_model) bf16  fc.weight.T
      g_ref    : (1, d_model) f32       layer_norm weight
      b_ref    : (1, d_model) f32       layer_norm bias
      [mask_ref: (1, TQ, Lk) f32]       optional additive attention bias
      out_ref  : (1, TQ, d_model) f32
      attn_ref : (1, H, TQ, Lk)  (bf16 by default)
      kh_cache : VMEM (Lk, H*d_k) bf16  per-batch K projection cache
      vh_cache : VMEM (Lv, H*d_v) bf16  per-batch V projection cache
    """
    if has_mask:
        (q_ref, k_ref, v_ref, wq_ref, wk_ref, wv_ref, wfc_ref, g_ref, b_ref,
         mask_ref, out_ref, attn_ref, kh_cache, vh_cache) = refs
    else:
        (q_ref, k_ref, v_ref, wq_ref, wk_ref, wv_ref, wfc_ref, g_ref, b_ref,
         out_ref, attn_ref, kh_cache, vh_cache) = refs
        mask_ref = None

    # K/V projections for all heads, computed only on the first q-tile of each
    # batch and cached in VMEM (the q-tile grid axis is "arbitrary", so i==0 is
    # always visited first for a given batch on a given core).
    @pl.when(pl.program_id(1) == 0)
    def _():
        xk = k_ref[0]                                                 # (Lk, dm) bf16
        xv = v_ref[0]                                                 # (Lv, dm) bf16
        kh_cache[...] = jnp.dot(
            xk, wk_ref[...], preferred_element_type=jnp.float32
        ).astype(kh_cache.dtype)
        vh_cache[...] = jnp.dot(
            xv, wv_ref[...], preferred_element_type=jnp.float32
        ).astype(vh_cache.dtype)

    xq = q_ref[0]                                                     # (TQ, dm) f32

    # Q projection for all heads at once (wide MXU output); fold 1/temperature
    # into q before the score matmuls.
    qh_all = jnp.dot(xq.astype(jnp.bfloat16), wq_ref[...],
                     preferred_element_type=jnp.float32)              # (TQ, H*dk) f32
    qh_all = (qh_all * inv_temperature).astype(jnp.bfloat16)

    mask_f32 = mask_ref[0] if has_mask else None                      # (TQ, Lk) f32

    o_parts = []
    for h in range(n_head):                                           # static unroll
        qh = qh_all[:, h * d_k:(h + 1) * d_k]                         # (TQ, dk) bf16
        kh = kh_cache[:, h * d_k:(h + 1) * d_k]                       # (Lk, dk) bf16
        scores = lax.dot_general(
            qh, kh, dimension_numbers=(((1,), (1,)), ((), ())),
            preferred_element_type=jnp.float32)                       # (TQ, Lk) f32
        if has_mask:
            scores = scores + mask_f32

        # Softmax over keys (f32 math; attn_dropout is identity in eval mode).
        m = jnp.max(scores, axis=-1, keepdims=True)
        e = jnp.exp(scores - m)
        s = jnp.sum(e, axis=-1, keepdims=True)
        attn = e * pl.reciprocal(s, approx=True)                      # (TQ, Lk) f32
        attn_ref[0, h] = attn.astype(attn_ref.dtype)

        vh = vh_cache[:, h * d_v:(h + 1) * d_v]                       # (Lv, dv) bf16
        o_parts.append(jnp.dot(attn.astype(jnp.bfloat16), vh,
                               preferred_element_type=jnp.float32))   # (TQ, dv) f32

    # Single wide fc matmul (contraction = n_head*d_v) over concatenated heads.
    o_cat = jnp.concatenate(o_parts, axis=-1)                         # (TQ, H*dv) f32
    proj = jnp.dot(o_cat.astype(jnp.bfloat16), wfc_ref[...],
                   preferred_element_type=jnp.float32)                # (TQ, dm) f32

    # Residual add + LayerNorm (f32), single store to the output block.
    y = proj + xq                                                     # dropout = id
    mu = jnp.mean(y, axis=-1, keepdims=True)
    var = jnp.mean(jnp.square(y - mu), axis=-1, keepdims=True)
    yn = (y - mu) * lax.rsqrt(var + eps)
    out_ref[0] = (yn * g_ref[...] + b_ref[...]).astype(out_ref.dtype)


def multi_head_attention(q, k, v, wq, wk, wv, wfc, ln_gamma, ln_beta,
                         n_head, d_k, d_v, mask=None, *,
                         q_tile=256, attn_dtype=jnp.bfloat16):
    """q,k,v: (B, L, d_model) f32.
    wq/wk: (n_head*d_k, d_model); wv: (n_head*d_v, d_model);
    wfc: (d_model, n_head*d_v)   (torch nn.Linear layouts, bias=False).
    ln_gamma/ln_beta: (d_model,).  mask: optional additive bias (B, Lq, Lk).
    Returns (out (B, Lq, d_model) f32, attn (B, n_head, Lq, Lk) `attn_dtype`)."""
    B, Lq, d_model = q.shape
    Lk = k.shape[1]
    Lv = v.shape[1]
    assert Lk == Lv

    # Host-side layout/dtype glue (done once): torch Linear is y = x @ W.T.
    wq_full = jnp.asarray(wq).T.astype(jnp.bfloat16)      # (dm, H*dk)
    wk_full = jnp.asarray(wk).T.astype(jnp.bfloat16)      # (dm, H*dk)
    wv_full = jnp.asarray(wv).T.astype(jnp.bfloat16)      # (dm, H*dv)
    wfc_full = jnp.asarray(wfc).T.astype(jnp.bfloat16)    # (H*dv, dm)
    gamma2 = ln_gamma.reshape(1, d_model).astype(jnp.float32)
    beta2 = ln_beta.reshape(1, d_model).astype(jnp.float32)
    q = q.astype(jnp.float32)
    k_bf = k.astype(jnp.bfloat16)
    v_bf = v.astype(jnp.bfloat16)

    TQ = min(q_tile, Lq)
    num_q_tiles = pl.cdiv(Lq, TQ)
    has_mask = mask is not None

    kernel = functools.partial(
        _mha_kernel, n_head=n_head, d_k=d_k, d_v=d_v,
        inv_temperature=1.0 / (float(d_k) ** 0.5), eps=1e-6, has_mask=has_mask)

    in_specs = [
        pl.BlockSpec((1, TQ, d_model), lambda b, i: (b, i, 0)),        # q (residual)
        pl.BlockSpec((1, Lk, d_model), lambda b, i: (b, 0, 0)),        # k (bf16)
        pl.BlockSpec((1, Lv, d_model), lambda b, i: (b, 0, 0)),        # v (bf16)
        pl.BlockSpec((d_model, n_head * d_k), lambda b, i: (0, 0)),    # Wq (resident)
        pl.BlockSpec((d_model, n_head * d_k), lambda b, i: (0, 0)),    # Wk (resident)
        pl.BlockSpec((d_model, n_head * d_v), lambda b, i: (0, 0)),    # Wv (resident)
        pl.BlockSpec((n_head * d_v, d_model), lambda b, i: (0, 0)),    # Wfc (resident)
        pl.BlockSpec((1, d_model), lambda b, i: (0, 0)),               # ln gamma
        pl.BlockSpec((1, d_model), lambda b, i: (0, 0)),               # ln beta
    ]
    args = [q, k_bf, v_bf, wq_full, wk_full, wv_full, wfc_full, gamma2, beta2]
    if has_mask:
        in_specs.append(pl.BlockSpec((1, TQ, Lk), lambda b, i: (b, i, 0)))
        args.append(mask.astype(jnp.float32))

    out, attn = pl.pallas_call(
        kernel,
        out_shape=(jax.ShapeDtypeStruct((B, Lq, d_model), jnp.float32),
                   jax.ShapeDtypeStruct((B, n_head, Lq, Lk), attn_dtype)),
        grid_spec=pltpu.PrefetchScalarGridSpec(
            num_scalar_prefetch=0,
            grid=(B, num_q_tiles),
            in_specs=in_specs,
            out_specs=(
                pl.BlockSpec((1, TQ, d_model), lambda b, i: (b, i, 0)),
                pl.BlockSpec((1, n_head, TQ, Lk), lambda b, i: (b, 0, i, 0)),
            ),
            scratch_shapes=[
                pltpu.VMEM((Lk, n_head * d_k), jnp.bfloat16),   # K projection cache
                pltpu.VMEM((Lv, n_head * d_v), jnp.bfloat16),   # V projection cache
            ],
        ),
        compiler_params=pltpu.CompilerParams(
            dimension_semantics=("parallel", "arbitrary")),
    )(*args)
    return out, attn


def _reference(q, k, v, wq, wk, wv, wfc, ln_gamma, ln_beta, n_head, d_k, d_v,
               mask=None, eps=1e-6):
    """Pure-JAX f32 transcription of the PyTorch forward (eval mode)."""
    B, Lq, d_model = q.shape
    Lk = k.shape[1]
    residual = q
    qp = (q @ wq.T).reshape(B, Lq, n_head, d_k).transpose(0, 2, 1, 3)
    kp = (k @ wk.T).reshape(B, Lk, n_head, d_k).transpose(0, 2, 1, 3)
    vp = (v @ wv.T).reshape(B, Lk, n_head, d_v).transpose(0, 2, 1, 3)
    scores = jnp.einsum('bhqd,bhkd->bhqk', qp, kp) / (d_k ** 0.5)
    if mask is not None:
        scores = scores + mask[:, None, :, :]
    attn = jax.nn.softmax(scores, axis=-1)
    o = jnp.einsum('bhqk,bhkd->bhqd', attn, vp)
    o = o.transpose(0, 2, 1, 3).reshape(B, Lq, n_head * d_v)
    o = o @ wfc.T
    o = o + residual
    mu = o.mean(-1, keepdims=True)
    var = ((o - mu) ** 2).mean(-1, keepdims=True)
    o = (o - mu) / jnp.sqrt(var + eps) * ln_gamma + ln_beta
    return o, attn


def _run_case(seed, B, L, d_model, n_head, d_k, d_v, use_mask, q_tile):
    keys = jax.random.split(jax.random.PRNGKey(seed), 8)
    q = jax.random.normal(keys[0], (B, L, d_model), jnp.float32)
    k = jax.random.normal(keys[1], (B, L, d_model), jnp.float32)
    v = jax.random.normal(keys[2], (B, L, d_model), jnp.float32)
    mask = (jax.random.normal(keys[3], (B, L, L), jnp.float32)
            if use_mask else None)

    sc_in = 1.0 / d_model ** 0.5
    wq = jax.random.normal(keys[4], (n_head * d_k, d_model), jnp.float32) * sc_in
    wk = jax.random.normal(keys[5], (n_head * d_k, d_model), jnp.float32) * sc_in
    wv = jax.random.normal(keys[6], (n_head * d_v, d_model), jnp.float32) * sc_in
    wfc = jax.random.normal(keys[7], (d_model, n_head * d_v), jnp.float32) * (
        1.0 / (n_head * d_v) ** 0.5)
    ln_gamma = jnp.ones((d_model,), jnp.float32)
    ln_beta = jnp.zeros((d_model,), jnp.float32)

    out, attn = multi_head_attention(q, k, v, wq, wk, wv, wfc, ln_gamma, ln_beta,
                                     n_head, d_k, d_v, mask=mask, q_tile=q_tile)
    out = jax.block_until_ready(out)
    attn = jax.block_until_ready(attn)
    ref_out, ref_attn = _reference(q, k, v, wq, wk, wv, wfc, ln_gamma, ln_beta,
                                   n_head, d_k, d_v, mask=mask)

    assert out.shape == (B, L, d_model), out.shape
    assert attn.shape == (B, n_head, L, L), attn.shape
    err_o = float(jnp.max(jnp.abs(out - ref_out)))
    err_a = float(jnp.max(jnp.abs(attn.astype(jnp.float32) - ref_attn)))
    # bf16 MXU operands / bf16 attn output -> loosened (but meaningful) bounds.
    assert err_o < 7.5e-2, f"out max abs err {err_o}"
    assert err_a < 2.5e-2, f"attn max abs err {err_a}"


if __name__ == "__main__":
    # Single q-tile, no mask.
    _run_case(0, B=2, L=8, d_model=32, n_head=4, d_k=16, d_v=16,
              use_mask=False, q_tile=256)
    # Single q-tile, additive mask.
    _run_case(0, B=2, L=8, d_model=32, n_head=4, d_k=16, d_v=16,
              use_mask=True, q_tile=256)
    # Multiple q-tiles (exercises the per-batch K/V projection cache reuse).
    _run_case(1, B=2, L=16, d_model=32, n_head=4, d_k=16, d_v=16,
              use_mask=True, q_tile=8)
    print("KERNEL_OK")
</pallas_src>

<mosaic_0001>
module attributes {stable_mosaic.version = 11 : i64} {
  func.func @_mha_kernel(%arg0: i32, %arg1: i32, %arg2: memref<1x8x32xf32, #tpu.memory_space<vmem>>, %arg3: memref<1x8x32xbf16, #tpu.memory_space<vmem>>, %arg4: memref<1x8x32xbf16, #tpu.memory_space<vmem>>, %arg5: memref<32x64xbf16, #tpu.memory_space<vmem>>, %arg6: memref<32x64xbf16, #tpu.memory_space<vmem>>, %arg7: memref<32x64xbf16, #tpu.memory_space<vmem>>, %arg8: memref<64x32xbf16, #tpu.memory_space<vmem>>, %arg9: memref<1x32xf32, #tpu.memory_space<vmem>>, %arg10: memref<1x32xf32, #tpu.memory_space<vmem>>, %arg11: memref<1x8x32xf32, #tpu.memory_space<vmem>>, %arg12: memref<1x4x8x8xbf16, #tpu.memory_space<vmem>>, %arg13: memref<8x64xbf16, #tpu.memory_space<vmem>>, %arg14: memref<8x64xbf16, #tpu.memory_space<vmem>>) attributes {dimension_semantics = [#tpu.dimension_semantics<parallel>, #tpu.dimension_semantics<arbitrary>], iteration_bounds = array<i64: 2, 1>, scalar_prefetch = 0 : i64, scratch_operands = 2 : i64, tpu.core_type = #tpu.core_type<tc>, window_params = [{transform_indices = @transform_0, window_bounds = array<i64: 1, 8, 32>}, {transform_indices = @transform_1, window_bounds = array<i64: 1, 8, 32>}, {transform_indices = @transform_2, window_bounds = array<i64: 1, 8, 32>}, {pipeline_mode = #tpu.pipeline_mode<synchronous>, transform_indices = @transform_3, window_bounds = array<i64: 32, 64>}, {pipeline_mode = #tpu.pipeline_mode<synchronous>, transform_indices = @transform_4, window_bounds = array<i64: 32, 64>}, {pipeline_mode = #tpu.pipeline_mode<synchronous>, transform_indices = @transform_5, window_bounds = array<i64: 32, 64>}, {pipeline_mode = #tpu.pipeline_mode<synchronous>, transform_indices = @transform_6, window_bounds = array<i64: 64, 32>}, {pipeline_mode = #tpu.pipeline_mode<synchronous>, transform_indices = @transform_7, window_bounds = array<i64: 1, 32>}, {pipeline_mode = #tpu.pipeline_mode<synchronous>, transform_indices = @transform_8, window_bounds = array<i64: 1, 32>}, {transform_indices = @transform_9, window_bounds = array<i64: 1, 8, 32>}, {transform_indices = @transform_10, window_bounds = array<i64: 1, 4, 8, 8>}]} {
    %c0_i32 = arith.constant 0 : i32
    %0 = arith.cmpi eq, %arg1, %c0_i32 : i32
    %1 = arith.extui %0 : i1 to i32
    %c0_i32_0 = arith.constant 0 : i32
    %2 = arith.cmpi ne, %1, %c0_i32_0 : i32
    scf.if %2 {
      %c0_63 = arith.constant 0 : index
      %c0_64 = arith.constant 0 : index
      %c0_65 = arith.constant 0 : index
      %123 = vector.load %arg3[%c0_63, %c0_64, %c0_65] : memref<1x8x32xbf16, #tpu.memory_space<vmem>>, vector<1x8x32xbf16>
      %124 = vector.shape_cast %123 : vector<1x8x32xbf16> to vector<8x32xbf16>
      %c0_66 = arith.constant 0 : index
      %c0_67 = arith.constant 0 : index
      %c0_68 = arith.constant 0 : index
      %125 = vector.load %arg4[%c0_66, %c0_67, %c0_68] : memref<1x8x32xbf16, #tpu.memory_space<vmem>>, vector<1x8x32xbf16>
      %126 = vector.shape_cast %125 : vector<1x8x32xbf16> to vector<8x32xbf16>
      %c0_69 = arith.constant 0 : index
      %c0_70 = arith.constant 0 : index
      %127 = vector.load %arg6[%c0_69, %c0_70] : memref<32x64xbf16, #tpu.memory_space<vmem>>, vector<32x64xbf16>
      %cst_71 = arith.constant dense<0.000000e+00> : vector<8x64xf32>
      %128 = tpu.matmul %124, %127, %cst_71 {dimension_numbers = #tpu.dot_dimension_numbers<[1], [0], [0], [1], [0, 0, 1, 1], [], []>} : vector<8x32xbf16>, vector<32x64xbf16>, vector<8x64xf32> -> vector<8x64xf32>
      %129 = arith.truncf %128 : vector<8x64xf32> to vector<8x64xbf16>
      %c0_72 = arith.constant 0 : index
      %c0_73 = arith.constant 0 : index
      %130 = vector.load %arg13[%c0_72, %c0_73] : memref<8x64xbf16, #tpu.memory_space<vmem>>, vector<8x64xbf16>
      tpu.vector_store %arg13[%c0_72, %c0_73], %129 {strides = array<i32>} : memref<8x64xbf16, #tpu.memory_space<vmem>>, vector<8x64xbf16>,
      %c0_74 = arith.constant 0 : index
      %c0_75 = arith.constant 0 : index
      %131 = vector.load %arg7[%c0_74, %c0_75] : memref<32x64xbf16, #tpu.memory_space<vmem>>, vector<32x64xbf16>
      %cst_76 = arith.constant dense<0.000000e+00> : vector<8x64xf32>
      %132 = tpu.matmul %126, %131, %cst_76 {dimension_numbers = #tpu.dot_dimension_numbers<[1], [0], [0], [1], [0, 0, 1, 1], [], []>} : vector<8x32xbf16>, vector<32x64xbf16>, vector<8x64xf32> -> vector<8x64xf32>
      %133 = arith.truncf %132 : vector<8x64xf32> to vector<8x64xbf16>
      %c0_77 = arith.constant 0 : index
      %c0_78 = arith.constant 0 : index
      %134 = vector.load %arg14[%c0_77, %c0_78] : memref<8x64xbf16, #tpu.memory_space<vmem>>, vector<8x64xbf16>
      tpu.vector_store %arg14[%c0_77, %c0_78], %133 {strides = array<i32>} : memref<8x64xbf16, #tpu.memory_space<vmem>>, vector<8x64xbf16>,
    } else {
    }
    %c0 = arith.constant 0 : index
    %c0_1 = arith.constant 0 : index
    %c0_2 = arith.constant 0 : index
    %3 = vector.load %arg2[%c0, %c0_1, %c0_2] : memref<1x8x32xf32, #tpu.memory_space<vmem>>, vector<1x8x32xf32>
    %4 = vector.shape_cast %3 : vector<1x8x32xf32> to vector<8x32xf32>
    %5 = arith.truncf %4 : vector<8x32xf32> to vector<8x32xbf16>
    %c0_3 = arith.constant 0 : index
    %c0_4 = arith.constant 0 : index
    %6 = vector.load %arg5[%c0_3, %c0_4] : memref<32x64xbf16, #tpu.memory_space<vmem>>, vector<32x64xbf16>
    %cst = arith.constant dense<0.000000e+00> : vector<8x64xf32>
    %7 = tpu.matmul %5, %6, %cst {dimension_numbers = #tpu.dot_dimension_numbers<[1], [0], [0], [1], [0, 0, 1, 1], [], []>} : vector<8x32xbf16>, vector<32x64xbf16>, vector<8x64xf32> -> vector<8x64xf32>
    %cst_5 = arith.constant 2.500000e-01 : f32
    %8 = vector.broadcast %cst_5 : f32 to vector<8x64xf32>
    %9 = arith.mulf %7, %8 : vector<8x64xf32>
    %10 = arith.truncf %9 : vector<8x64xf32> to vector<8x64xbf16>
    %11 = vector.extract_strided_slice %10 {offsets = [0, 0], sizes = [8, 16], strides = [1, 1]} : vector<8x64xbf16> to vector<8x16xbf16>
    %c0_6 = arith.constant 0 : index
    %c0_7 = arith.constant 0 : index
    %12 = vector.load %arg13[%c0_6, %c0_7] : memref<8x64xbf16, #tpu.memory_space<vmem>>, vector<8x16xbf16>
    %cst_8 = arith.constant dense<0.000000e+00> : vector<8x8xf32>
    %13 = tpu.matmul %11, %12, %cst_8 {dimension_numbers = #tpu.dot_dimension_numbers<[1], [1], [0], [0], [0, 0, 1, 0], [], []>} : vector<8x16xbf16>, vector<8x16xbf16>, vector<8x8xf32> -> vector<8x8xf32>
    %cst_9 = arith.constant dense<0xFF800000> : vector<8xf32>
    %14 = vector.multi_reduction <maximumf>, %13, %cst_9 [1] : vector<8x8xf32> to vector<8xf32>
    %15 = vector.shape_cast %14 : vector<8xf32> to vector<8x1xf32>
    %16 = vector.broadcast %15 : vector<8x1xf32> to vector<8x8xf32>
    %17 = arith.subf %13, %16 : vector<8x8xf32>
    %18 = math.exp %17 : vector<8x8xf32>
    %cst_10 = arith.constant dense<0.000000e+00> : vector<8xf32>
    %19 = vector.multi_reduction <add>, %18, %cst_10 [1] : vector<8x8xf32> to vector<8xf32>
    %20 = vector.shape_cast %19 : vector<8xf32> to vector<8x1xf32>
    %21 = tpu.reciprocal %20 {approx = true} : vector<8x1xf32> -> vector<8x1xf32>
    %22 = vector.broadcast %21 : vector<8x1xf32> to vector<8x8xf32>
    %23 = arith.mulf %18, %22 : vector<8x8xf32>
    %24 = arith.truncf %23 : vector<8x8xf32> to vector<8x8xbf16>
    %c0_11 = arith.constant 0 : index
    %c0_12 = arith.constant 0 : index
    %c0_13 = arith.constant 0 : index
    %c0_14 = arith.constant 0 : index
    %25 = vector.load %arg12[%c0_11, %c0_12, %c0_13, %c0_14] : memref<1x4x8x8xbf16, #tpu.memory_space<vmem>>, vector<1x1x8x8xbf16>
    %26 = vector.shape_cast %25 : vector<1x1x8x8xbf16> to vector<8x8xbf16>
    %27 = vector.shape_cast %24 : vector<8x8xbf16> to vector<1x1x8x8xbf16>
    tpu.vector_store %arg12[%c0_11, %c0_12, %c0_13, %c0_14], %27 {strides = array<i32>} : memref<1x4x8x8xbf16, #tpu.memory_space<vmem>>, vector<1x1x8x8xbf16>,
    %c0_15 = arith.constant 0 : index
    %c0_16 = arith.constant 0 : index
    %28 = vector.load %arg14[%c0_15, %c0_16] : memref<8x64xbf16, #tpu.memory_space<vmem>>, vector<8x16xbf16>
    %29 = arith.truncf %23 : vector<8x8xf32> to vector<8x8xbf16>
    %cst_17 = arith.constant dense<0.000000e+00> : vector<8x16xf32>
    %30 = tpu.matmul %29, %28, %cst_17 {dimension_numbers = #tpu.dot_dimension_numbers<[1], [0], [0], [1], [0, 0, 1, 1], [], []>} : vector<8x8xbf16>, vector<8x16xbf16>, vector<8x16xf32> -> vector<8x16xf32>
    %31 = vector.extract_strided_slice %10 {offsets = [0, 16], sizes = [8, 16], strides = [1, 1]} : vector<8x64xbf16> to vector<8x16xbf16>
    %c0_18 = arith.constant 0 : index
    %c16 = arith.constant 16 : index
    %32 = vector.load %arg13[%c0_18, %c16] : memref<8x64xbf16, #tpu.memory_space<vmem>>, vector<8x16xbf16>
    %cst_19 = arith.constant dense<0.000000e+00> : vector<8x8xf32>
    %33 = tpu.matmul %31, %32, %cst_19 {dimension_numbers = #tpu.dot_dimension_numbers<[1], [1], [0], [0], [0, 0, 1, 0], [], []>} : vector<8x16xbf16>, vector<8x16xbf16>, vector<8x8xf32> -> vector<8x8xf32>
    %cst_20 = arith.constant dense<0xFF800000> : vector<8xf32>
    %34 = vector.multi_reduction <maximumf>, %33, %cst_20 [1] : vector<8x8xf32> to vector<8xf32>
    %35 = vector.shape_cast %34 : vector<8xf32> to vector<8x1xf32>
    %36 = vector.broadcast %35 : vector<8x1xf32> to vector<8x8xf32>
    %37 = arith.subf %33, %36 : vector<8x8xf32>
    %38 = math.exp %37 : vector<8x8xf32>
    %cst_21 = arith.constant dense<0.000000e+00> : vector<8xf32>
    %39 = vector.multi_reduction <add>, %38, %cst_21 [1] : vector<8x8xf32> to vector<8xf32>
    %40 = vector.shape_cast %39 : vector<8xf32> to vector<8x1xf32>
    %41 = tpu.reciprocal %40 {approx = true} : vector<8x1xf32> -> vector<8x1xf32>
    %42 = vector.broadcast %41 : vector<8x1xf32> to vector<8x8xf32>
    %43 = arith.mulf %38, %42 : vector<8x8xf32>
    %44 = arith.truncf %43 : vector<8x8xf32> to vector<8x8xbf16>
    %c0_22 = arith.constant 0 : index
    %c1 = arith.constant 1 : index
    %c0_23 = arith.constant 0 : index
    %c0_24 = arith.constant 0 : index
    %45 = vector.load %arg12[%c0_22, %c1, %c0_23, %c0_24] : memref<1x4x8x8xbf16, #tpu.memory_space<vmem>>, vector<1x1x8x8xbf16>
    %46 = vector.shape_cast %45 : vector<1x1x8x8xbf16> to vector<8x8xbf16>
    %47 = vector.shape_cast %44 : vector<8x8xbf16> to vector<1x1x8x8xbf16>
    tpu.vector_store %arg12[%c0_22, %c1, %c0_23, %c0_24], %47 {strides = array<i32>} : memref<1x4x8x8xbf16, #tpu.memory_space<vmem>>, vector<1x1x8x8xbf16>,
    %c0_25 = arith.constant 0 : index
    %c16_26 = arith.constant 16 : index
    %48 = vector.load %arg14[%c0_25, %c16_26] : memref<8x64xbf16, #tpu.memory_space<vmem>>, vector<8x16xbf16>
    %49 = arith.truncf %43 : vector<8x8xf32> to vector<8x8xbf16>
    %cst_27 = arith.constant dense<0.000000e+00> : vector<8x16xf32>
    %50 = tpu.matmul %49, %48, %cst_27 {dimension_numbers = #tpu.dot_dimension_numbers<[1], [0], [0], [1], [0, 0, 1, 1], [], []>} : vector<8x8xbf16>, vector<8x16xbf16>, vector<8x16xf32> -> vector<8x16xf32>
    %51 = vector.extract_strided_slice %10 {offsets = [0, 32], sizes = [8, 16], strides = [1, 1]} : vector<8x64xbf16> to vector<8x16xbf16>
    %c0_28 = arith.constant 0 : index
    %c32 = arith.constant 32 : index
    %52 = vector.load %arg13[%c0_28, %c32] : memref<8x64xbf16, #tpu.memory_space<vmem>>, vector<8x16xbf16>
    %cst_29 = arith.constant dense<0.000000e+00> : vector<8x8xf32>
    %53 = tpu.matmul %51, %52, %cst_29 {dimension_numbers = #tpu.dot_dimension_numbers<[1], [1], [0], [0], [0, 0, 1, 0], [], []>} : vector<8x16xbf16>, vector<8x16xbf16>, vector<8x8xf32> -> vector<8x8xf32>
    %cst_30 = arith.constant dense<0xFF800000> : vector<8xf32>
    %54 = vector.multi_reduction <maximumf>, %53, %cst_30 [1] : vector<8x8xf32> to vector<8xf32>
    %55 = vector.shape_cast %54 : vector<8xf32> to vector<8x1xf32>
    %56 = vector.broadcast %55 : vector<8x1xf32> to vector<8x8xf32>
    %57 = arith.subf %53, %56 : vector<8x8xf32>
    %58 = math.exp %57 : vector<8x8xf32>
    %cst_31 = arith.constant dense<0.000000e+00> : vector<8xf32>
    %59 = vector.multi_reduction <add>, %58, %cst_31 [1] : vector<8x8xf32> to vector<8xf32>
    %60 = vector.shape_cast %59 : vector<8xf32> to vector<8x1xf32>
    %61 = tpu.reciprocal %60 {approx = true} : vector<8x1xf32> -> vector<8x1xf32>
    %62 = vector.broadcast %61 : vector<8x1xf32> to vector<8x8xf32>
    %63 = arith.mulf %58, %62 : vector<8x8xf32>
    %64 = arith.truncf %63 : vector<8x8xf32> to vector<8x8xbf16>
    %c0_32 = arith.constant 0 : index
    %c2 = arith.constant 2 : index
    %c0_33 = arith.constant 0 : index
    %c0_34 = arith.constant 0 : index
    %65 = vector.load %arg12[%c0_32, %c2, %c0_33, %c0_34] : memref<1x4x8x8xbf16, #tpu.memory_space<vmem>>, vector<1x1x8x8xbf16>
    %66 = vector.shape_cast %65 : vector<1x1x8x8xbf16> to vector<8x8xbf16>
    %67 = vector.shape_cast %64 : vector<8x8xbf16> to vector<1x1x8x8xbf16>
    tpu.vector_store %arg12[%c0_32, %c2, %c0_33, %c0_34], %67 {strides = array<i32>} : memref<1x4x8x8xbf16, #tpu.memory_space<vmem>>, vector<1x1x8x8xbf16>,
    %c0_35 = arith.constant 0 : index
    %c32_36 = arith.constant 32 : index
    %68 = vector.load %arg14[%c0_35, %c32_36] : memref<8x64xbf16, #tpu.memory_space<vmem>>, vector<8x16xbf16>
    %69 = arith.truncf %63 : vector<8x8xf32> to vector<8x8xbf16>
    %cst_37 = arith.constant dense<0.000000e+00> : vector<8x16xf32>
    %70 = tpu.matmul %69, %68, %cst_37 {dimension_numbers = #tpu.dot_dimension_numbers<[1], [0], [0], [1], [0, 0, 1, 1], [], []>} : vector<8x8xbf16>, vector<8x16xbf16>, vector<8x16xf32> -> vector<8x16xf32>
    %71 = vector.extract_strided_slice %10 {offsets = [0, 48], sizes = [8, 16], strides = [1, 1]} : vector<8x64xbf16> to vector<8x16xbf16>
    %c0_38 = arith.constant 0 : index
    %c48 = arith.constant 48 : index
    %72 = vector.load %arg13[%c0_38, %c48] : memref<8x64xbf16, #tpu.memory_space<vmem>>, vector<8x16xbf16>
    %cst_39 = arith.constant dense<0.000000e+00> : vector<8x8xf32>
    %73 = tpu.matmul %71, %72, %cst_39 {dimension_numbers = #tpu.dot_dimension_numbers<[1], [1], [0], [0], [0, 0, 1, 0], [], []>} : vector<8x16xbf16>, vector<8x16xbf16>, vector<8x8xf32> -> vector<8x8xf32>
    %cst_40 = arith.constant dense<0xFF800000> : vector<8xf32>
    %74 = vector.multi_reduction <maximumf>, %73, %cst_40 [1] : vector<8x8xf32> to vector<8xf32>
    %75 = vector.shape_cast %74 : vector<8xf32> to vector<8x1xf32>
    %76 = vector.broadcast %75 : vector<8x1xf32> to vector<8x8xf32>
    %77 = arith.subf %73, %76 : vector<8x8xf32>
    %78 = math.exp %77 : vector<8x8xf32>
    %cst_41 = arith.constant dense<0.000000e+00> : vector<8xf32>
    %79 = vector.multi_reduction <add>, %78, %cst_41 [1] : vector<8x8xf32> to vector<8xf32>
    %80 = vector.shape_cast %79 : vector<8xf32> to vector<8x1xf32>
    %81 = tpu.reciprocal %80 {approx = true} : vector<8x1xf32> -> vector<8x1xf32>
    %82 = vector.broadcast %81 : vector<8x1xf32> to vector<8x8xf32>
    %83 = arith.mulf %78, %82 : vector<8x8xf32>
    %84 = arith.truncf %83 : vector<8x8xf32> to vector<8x8xbf16>
    %c0_42 = arith.constant 0 : index
    %c3 = arith.constant 3 : index
    %c0_43 = arith.constant 0 : index
    %c0_44 = arith.constant 0 : index
    %85 = vector.load %arg12[%c0_42, %c3, %c0_43, %c0_44] : memref<1x4x8x8xbf16, #tpu.memory_space<vmem>>, vector<1x1x8x8xbf16>
    %86 = vector.shape_cast %85 : vector<1x1x8x8xbf16> to vector<8x8xbf16>
    %87 = vector.shape_cast %84 : vector<8x8xbf16> to vector<1x1x8x8xbf16>
    tpu.vector_store %arg12[%c0_42, %c3, %c0_43, %c0_44], %87 {strides = array<i32>} : memref<1x4x8x8xbf16, #tpu.memory_space<vmem>>, vector<1x1x8x8xbf16>,
    %c0_45 = arith.constant 0 : index
    %c48_46 = arith.constant 48 : index
    %88 = vector.load %arg14[%c0_45, %c48_46] : memref<8x64xbf16, #tpu.memory_space<vmem>>, vector<8x16xbf16>
    %89 = arith.truncf %83 : vector<8x8xf32> to vector<8x8xbf16>
    %cst_47 = arith.constant dense<0.000000e+00> : vector<8x16xf32>
    %90 = tpu.matmul %89, %88, %cst_47 {dimension_numbers = #tpu.dot_dimension_numbers<[1], [0], [0], [1], [0, 0, 1, 1], [], []>} : vector<8x8xbf16>, vector<8x16xbf16>, vector<8x16xf32> -> vector<8x16xf32>
    %91 = tpu.concatenate %30, %50, %70, %90 in 1 : vector<8x16xf32>, vector<8x16xf32>, vector<8x16xf32>, vector<8x16xf32> -> vector<8x64xf32>
    %92 = arith.truncf %91 : vector<8x64xf32> to vector<8x64xbf16>
    %c0_48 = arith.constant 0 : index
    %c0_49 = arith.constant 0 : index
    %93 = vector.load %arg8[%c0_48, %c0_49] : memref<64x32xbf16, #tpu.memory_space<vmem>>, vector<64x32xbf16>
    %cst_50 = arith.constant dense<0.000000e+00> : vector<8x32xf32>
    %94 = tpu.matmul %92, %93, %cst_50 {dimension_numbers = #tpu.dot_dimension_numbers<[1], [0], [0], [1], [0, 0, 1, 1], [], []>} : vector<8x64xbf16>, vector<64x32xbf16>, vector<8x32xf32> -> vector<8x32xf32>
    %95 = arith.addf %94, %4 : vector<8x32xf32>
    %cst_51 = arith.constant dense<0.000000e+00> : vector<8xf32>
    %96 = vector.multi_reduction <add>, %95, %cst_51 [1] : vector<8x32xf32> to vector<8xf32>
    %97 = vector.shape_cast %96 : vector<8xf32> to vector<8x1xf32>
    %cst_52 = arith.constant 3.200000e+01 : f32
    %98 = vector.broadcast %cst_52 : f32 to vector<8x1xf32>
    %99 = arith.divf %97, %98 : vector<8x1xf32>
    %100 = vector.broadcast %99 : vector<8x1xf32> to vector<8x32xf32>
    %101 = arith.subf %95, %100 : vector<8x32xf32>
    %102 = arith.mulf %101, %101 : vector<8x32xf32>
    %cst_53 = arith.constant dense<0.000000e+00> : vector<8xf32>
    %103 = vector.multi_reduction <add>, %102, %cst_53 [1] : vector<8x32xf32> to vector<8xf32>
    %104 = vector.shape_cast %103 : vector<8xf32> to vector<8x1xf32>
    %cst_54 = arith.constant 3.200000e+01 : f32
    %105 = vector.broadcast %cst_54 : f32 to vector<8x1xf32>
    %106 = arith.divf %104, %105 : vector<8x1xf32>
    %107 = vector.broadcast %99 : vector<8x1xf32> to vector<8x32xf32>
    %108 = arith.subf %95, %107 : vector<8x32xf32>
    %cst_55 = arith.constant 9.99999997E-7 : f32
    %109 = vector.broadcast %cst_55 : f32 to vector<8x1xf32>
    %110 = arith.addf %106, %109 : vector<8x1xf32>
    %111 = math.rsqrt %110 : vector<8x1xf32>
    %112 = vector.broadcast %111 : vector<8x1xf32> to vector<8x32xf32>
    %113 = arith.mulf %108, %112 : vector<8x32xf32>
    %c0_56 = arith.constant 0 : index
    %c0_57 = arith.constant 0 : index
    %114 = vector.load %arg9[%c0_56, %c0_57] : memref<1x32xf32, #tpu.memory_space<vmem>>, vector<1x32xf32>
    %115 = vector.broadcast %114 : vector<1x32xf32> to vector<8x32xf32>
    %116 = arith.mulf %113, %115 : vector<8x32xf32>
    %c0_58 = arith.constant 0 : index
    %c0_59 = arith.constant 0 : index
    %117 = vector.load %arg10[%c0_58, %c0_59] : memref<1x32xf32, #tpu.memory_space<vmem>>, vector<1x32xf32>
    %118 = vector.broadcast %117 : vector<1x32xf32> to vector<8x32xf32>
    %119 = arith.addf %116, %118 : vector<8x32xf32>
    %c0_60 = arith.constant 0 : index
    %c0_61 = arith.constant 0 : index
    %c0_62 = arith.constant 0 : index
    %120 = vector.load %arg11[%c0_60, %c0_61, %c0_62] : memref<1x8x32xf32, #tpu.memory_space<vmem>>, vector<1x8x32xf32>
    %121 = vector.shape_cast %120 : vector<1x8x32xf32> to vector<8x32xf32>
    %122 = vector.shape_cast %119 : vector<8x32xf32> to vector<1x8x32xf32>
    tpu.vector_store %arg11[%c0_60, %c0_61, %c0_62], %122 {strides = array<i32>} : memref<1x8x32xf32, #tpu.memory_space<vmem>>, vector<1x8x32xf32>,
    return
  }
  func.func @transform_0(%arg0: i32, %arg1: i32) -> (i32, i32, i32) {
    %c0_i32 = arith.constant 0 : i32
    %c0_i32_0 = arith.constant 0 : i32
    return %arg0, %arg1, %c0_i32 : i32, i32, i32
  }
  func.func @transform_1(%arg0: i32, %arg1: i32) -> (i32, i32, i32) {
    %c0_i32 = arith.constant 0 : i32
    %c0_i32_0 = arith.constant 0 : i32
    %c0_i32_1 = arith.constant 0 : i32
    return %arg0, %c0_i32, %c0_i32_0 : i32, i32, i32
  }
  func.func @transform_2(%arg0: i32, %arg1: i32) -> (i32, i32, i32) {
    %c0_i32 = arith.constant 0 : i32
    %c0_i32_0 = arith.constant 0 : i32
    %c0_i32_1 = arith.constant 0 : i32
    return %arg0, %c0_i32, %c0_i32_0 : i32, i32, i32
  }
  func.func @transform_3(%arg0: i32, %arg1: i32) -> (i32, i32) {
    %c0_i32 = arith.constant 0 : i32
    %c0_i32_0 = arith.constant 0 : i32
    %c0_i32_1 = arith.constant 0 : i32
    return %c0_i32, %c0_i32_0 : i32, i32
  }
  func.func @transform_4(%arg0: i32, %arg1: i32) -> (i32, i32) {
    %c0_i32 = arith.constant 0 : i32
    %c0_i32_0 = arith.constant 0 : i32
    %c0_i32_1 = arith.constant 0 : i32
    return %c0_i32, %c0_i32_0 : i32, i32
  }
  func.func @transform_5(%arg0: i32, %arg1: i32) -> (i32, i32) {
    %c0_i32 = arith.constant 0 : i32
    %c0_i32_0 = arith.constant 0 : i32
    %c0_i32_1 = arith.constant 0 : i32
    return %c0_i32, %c0_i32_0 : i32, i32
  }
  func.func @transform_6(%arg0: i32, %arg1: i32) -> (i32, i32) {
    %c0_i32 = arith.constant 0 : i32
    %c0_i32_0 = arith.constant 0 : i32
    %c0_i32_1 = arith.constant 0 : i32
    return %c0_i32, %c0_i32_0 : i32, i32
  }
  func.func @transform_7(%arg0: i32, %arg1: i32) -> (i32, i32) {
    %c0_i32 = arith.constant 0 : i32
    %c0_i32_0 = arith.constant 0 : i32
    %c0_i32_1 = arith.constant 0 : i32
    return %c0_i32, %c0_i32_0 : i32, i32
  }
  func.func @transform_8(%arg0: i32, %arg1: i32) -> (i32, i32) {
    %c0_i32 = arith.constant 0 : i32
    %c0_i32_0 = arith.constant 0 : i32
    %c0_i32_1 = arith.constant 0 : i32
    return %c0_i32, %c0_i32_0 : i32, i32
  }
  func.func @transform_9(%arg0: i32, %arg1: i32) -> (i32, i32, i32) {
    %c0_i32 = arith.constant 0 : i32
    %c0_i32_0 = arith.constant 0 : i32
    return %arg0, %arg1, %c0_i32 : i32, i32, i32
  }
  func.func @transform_10(%arg0: i32, %arg1: i32) -> (i32, i32, i32, i32) {
    %c0_i32 = arith.constant 0 : i32
    %c0_i32_0 = arith.constant 0 : i32
    %c0_i32_1 = arith.constant 0 : i32
    return %arg0, %c0_i32, %arg1, %c0_i32_0 : i32, i32, i32, i32
  }
}

</mosaic_0001>

<bundles_post_ra>
// kernel: tpu_custom_call.1
= control target key start
LH: loop header
LB: loop body
LE: loop exit
PB: predicated region body
PF: predicated region fallthrough
CT: control target
= control target key end

     0   :  { %s2472_s0 = inlined_call_operand.vmem [shape: f32[2,8,32], index: 0, kind: input, shape index: {}]   ;;  %s2473_s1 = inlined_call_operand.hbm [shape: bf16[2,8,32], index: 1, kind: input, shape index: {}]   ;;  %s2474_s2 = inlined_call_operand.hbm [shape: bf16[2,8,32], index: 2, kind: input, shape index: {}]   ;;  %s2475_s3 = inlined_call_operand.vmem [shape: bf16[32,64], index: 3, kind: input, shape index: {}]   ;;  %s2476_s4 = inlined_call_operand.vmem [shape: bf16[32,64], index: 4, kind: input, shape index: {}]   ;;  %s2477_s5 = inlined_call_operand.hbm [shape: bf16[32,64], index: 5, kind: input, shape index: {}]   ;;  %s2478_s6 = inlined_call_operand.vmem [shape: bf16[64,32], index: 6, kind: input, shape index: {}]   ;;  %s2479_s7 = inlined_call_operand.vmem [shape: f32[1,32], index: 7, kind: input, shape index: {}]   ;;  %s2480_s8 = inlined_call_operand.vmem [shape: f32[1,32], index: 8, kind: input, shape index: {}]   ;;  %s2481_s9 = inlined_call_operand.hbm [shape: f32[2,8,32], index: 9, kind: output, shape index: {0}]   ;;  %s2482_s10 = inlined_call_operand.hbm [shape: bf16[2,4,8,8], index: 10, kind: output, shape index: {1}]  }
   0x1   :  { %2493 = sst [smem:[#allocation24_spill]] %s2477_s5 }
   0x2   :  { %2494 = sst [smem:[#allocation25_spill]] %s2480_s8 }
   0x3   :  { %2495 = sst [smem:[#allocation26_spill]] %s2481_s9 }
   0x4   :  { %16 = vsyncpa [#allocation5], 0 }
   0x5   :  { %18 = vsyncpa [#allocation5 + $0x1], 0 }
   0x6   :  { %19 = vsyncpa [#allocation8], 0 }
   0x7   :  { %21 = vsyncpa [#allocation8 + $0x1], 0 }
   0x8   :  { %22 = vsyncpa [#allocation6], 0 }
   0x9   :  { %24 = vsyncpa [#allocation6 + $0x1], 0 }
   0xa   :  { %25 = vsyncpa [#allocation12], 0 }
   0xb   :  { %27 = vsyncpa [#allocation12 + $0x1], 0  ;;  %s2053_s13 = smov 0   ;;  %s2055_s14 = smov 0  }
   0xc   :  { %s2057_s15 = smov 0   ;;  %s2059_s16 = smov 0  }
   0xd   :  { %s2061_s17 = smov 0   ;;  %s2063_s18 = smov 0  }
   0xe LB: > { %2496 = sst [smem:[#allocation18_spill]] %s1959_s13  ;;  %s2084_s19 = sadd.s32 4294967295, %s1979_s18   ;;  %s1979_s18 = sphi %s2063_s18, %s33_s18   ;;  %s1975_s17 = sphi %s2061_s17, %s2525_s17   ;;  %s1971_s16 = sphi %s2059_s16, %s2524_s16   ;;  %s1967_s15 = sphi %s2057_s15, %s2523_s15   ;;  %s1963_s14 = sphi %s2055_s14, %s2527_s14   ;;  %s1959_s13 = sphi %s2053_s13, %s2526_s13  }
   0xf   : > { %2497 = sst [smem:[#allocation19_spill]] %s1967_s15  ;;  %s1470_s20 = sadd.s32 4294967294, %s1979_s18  }
  0x10   : > { %2498 = sst [smem:[#allocation20_spill]] %s1975_s17  ;;  %p93_p0 = scmp.ne.s32.totalorder %s1963_s14, %s1959_s13 }
  0x11   : > { %p2484_p1 = scmp.eq.s32.totalorder %s2084_s19, 0  ;;  %p277_p3 = scmp.eq.s32.totalorder %s1470_s20, 1 }
  0x12   : > { %p1471_p5 = scmp.ge.s32.totalorder %s1979_s18, 1  ;;  %p312_p7 = scmp.lt.s32.totalorder %s1979_s18, 3 }
  0x13   : > { %p2093_p4 = por %p2484_p1, %p93_p0  ;;  %p2098_p6 = por %p277_p3, %p93_p0 }
  0x14   : > { %p2103_p8 = pnand %p1471_p5, %p312_p7  ;;  %s1981_s24 = smov [#allocation9]  }
  0x15   : > { %s2499_s21 = scalar_select %p2093_p4, 1, 0 }
  0x16   : > { %s2500_s22 = scalar_select %p2098_p6, 1, 0 }
  0x17   : > { %s2502_s23 = scalar_select %p2103_p8, 1, 0 }
  0x18   : > { %2501 = sst [smem:[#allocation21_spill]] %s2500_s22  ;;  %s330_s25 = sshll.u32 %s1981_s24, 4  ;;  %s331_s25 = int_to_ptr.vmem [resolvable:$true] %s330_s25 }
  0x19   : > { %p1652_p9 = pneg %p2103_p8  ;;  %s45_s27 = sadd.s32 1, %s1975_s17 }
  0x1a   : > { %s2504_s5 = sld [smem:[#allocation24_spill]] }
  0x1b   : > { %p2112_p11 = pnand %p1652_p9, %p2484_p1 }
  0x1d   : > { %p1771_p13 = pneg %p2112_p11 }
  0x20   : > { %s1769_s30 = scalar_lea.hbm %s2504_s5, 256 }
  0x21   : > { %p1770_p12 = scmp.ne.s32.totalorder %s2504_s5, %s1769_s30  ;;  %p1776_p5 = scmp.lt.u32.totalorder %s1769_s30, %s2504_s5 }
  0x23   : > { %p1772_p0 = pnand %p1771_p13, %p1770_p12 }
  0x25   : > { %p1773_p3 = pneg %p1772_p0 }
  0x27   : > { %p1778_p7 = pnand %p1776_p5, %p1773_p3 }
  0x29   : > { %1781 = shalt.err (!%p1778_p7)
}
  0x2a   : > { %s1782_s22 = scalar_lea.vmem %s331_s25, 256  ;;  %p1790_p2 = scmp.lt.s32.totalorder %s331_s25, %s331_s25 }
  0x2b   : > { %p1783_p9 = scmp.ne.s32.totalorder %s331_s25, %s1782_s22  ;;  %p1791_p6 = scmp.lt.s32.totalorder %s1782_s22, %s1782_s22 }
  0x2d   : > { %p1785_p10 = pnand %p1783_p9, %p1771_p13  ;;  %p1792_p4 = por %p1791_p6, %p1790_p2 }
  0x2f   : > { %p1786_p1 = pneg %p1785_p10 }
  0x31   : > { %p1793_p8 = pnand %p1792_p4, %p1786_p1 }
  0x33   : > { %1796 = shalt.err (!%p1793_p8)
}
  0x34   : > { %s1982_s28 = smov 64   ;;  %s1983_s29 = smov 4  }
  0x35   : > { %1655 = dma.hbm_to_vmem [thread:$0]  (!%p2112_p11), %s2504_s5, 256, %s331_s25, [#allocation8], %s1982_s28, %s1982_s28, %s1983_s29  }
  0x36   : > { %p47_p1 = scmp.ge.s32.totalorder %s45_s27, 2  ;;  %s80_s22 = sadd.s32 1, %s1967_s15 }
  0x37   : > { %p87_p2 = scmp.ne.s32.totalorder %s1967_s15, %s1963_s14  ;;  %p88_p4 = scmp.eq.s32.totalorder %s1979_s18, 0 }
  0x38   : > { %s2529_s27 = smov (%p47_p1, %s45_s27), 0  ;;  %p2507_p8 = scmp.eq.s32.totalorder %s2084_s19, 1 }
  0x39   : > { %2505 = sst [smem:[#allocation22_spill]] %s2529_s27  ;;  %p2139_p6 = por %p88_p4, %p87_p2 }
  0x3a   : > { %p2145_p10 = por %p2507_p8, %p87_p2  ;;  %s77_s20 = ssub.s32 %s1975_s17, %s2529_s27 }
  0x3b   : > { %p1671_p11 = scmp.lt.s32.totalorder %s1979_s18, 2  ;;  %p78_p12 = scmp.eq.s32.totalorder %s77_s20, 0 }
  0x3c   : > { %s2508_s26 = scalar_select %p2145_p10, 1, 0 }
  0x3d   : > { %s363_s25 = sand.u32 1, %s1967_s15   ;;  %s1475_s29 = sshll.u32 %s1975_s17, 6 }
  0x3e   : > { %s2153_s24 = sshll.u32 %s363_s25, 2  ;;  %s2162_s5 = scalar_lea.hbm %s2473_s1, %s1475_s29 }
  0x3f   : > { %s2156_s28 = scalar_select %p78_p12, %s1967_s15, %s80_s22  }
  0x40   : > { %s367_s13 = scalar_lea.vmem [#allocation4], %s2153_s24  ;;  %p2169_p13 = pnand %p1671_p11, %p2139_p6 }
  0x41   : > { %2509 = sst [smem:[#allocation23_spill]] %s2156_s28  ;;  %s374_s27 = sshll.u32 %s367_s13, 4  ;;  %s2165_s27 = int_to_ptr.vmem [resolvable:$true] %s374_s27 }
  0x42   : > { %s2176_s30 = scalar_lea.hbm %s2474_s2, %s1475_s29  ;;  %s381_s11 = sand.u32 1, %s1979_s18  }
  0x43   : > { %s364_s28 = scalar_lea.sflag [#allocation5], %s363_s25  ;;  %s1797_s15 = scalar_lea.hbm %s2162_s5, 64 }
  0x44   : > { %p1798_p0 = scmp.ne.s32.totalorder %s2162_s5, %s1797_s15  ;;  %p1799_p3 = pneg %p2169_p13 }
  0x45   : > { %s1802_s9 = scalar_lea.hbm %s2473_s1, 128  ;;  %p1803_p9 = scmp.lt.u32.totalorder %s2162_s5, %s2473_s1 }
  0x46   : > { %p1800_p5 = pnand %p1799_p3, %p1798_p0  ;;  %p1804_p1 = scmp.lt.u32.totalorder %s1802_s9, %s1797_s15 }
  0x47   : > { %p1806_p4 = scmp.lt.u32.totalorder %s1797_s15, %s2162_s5 }
  0x48   : > { %p1801_p7 = pneg %p1800_p5  ;;  %p1805_p2 = por %p1804_p1, %p1803_p9 }
  0x4a   : > { %p1807_p6 = por %p1806_p4, %p1805_p2 }
  0x4c   : > { %p1808_p8 = pnand %p1807_p6, %p1801_p7 }
  0x4e   : > { %1811 = shalt.err (!%p1808_p8)
}
  0x4f   : > { %s1812_s25 = scalar_lea.vmem %s2165_s27, 64  ;;  %s1984_s29 = smov [#allocation4]  }
  0x50   : > { %p1813_p11 = scmp.ne.s32.totalorder %s2165_s27, %s1812_s25  ;;  %s1817_s22 = sshll.u32 %s1984_s29, 4  ;;  %s1818_s22 = int_to_ptr.vmem [resolvable:$false] %s1817_s22 }
  0x51   : > { %s1819_s8 = scalar_lea.vmem %s1818_s22, 128  ;;  %p1820_p5 = scmp.lt.s32.totalorder %s2165_s27, %s1818_s22 }
  0x52   : > { %p1815_p12 = pnand %p1813_p11, %p1799_p3  ;;  %p1821_p9 = scmp.lt.s32.totalorder %s1819_s8, %s1812_s25 }
  0x54   : > { %p1816_p0 = pneg %p1815_p12  ;;  %p1822_p1 = por %p1821_p9, %p1820_p5 }
  0x56   : > { %p1823_p2 = pnand %p1822_p1, %p1816_p0 }
  0x58   : > { %1826 = shalt.err (!%p1823_p2)
}
  0x59   : > { %1659 = dma.hbm_to_vmem [thread:$0]  (!%p2169_p13), %s2162_s5, 64, %s2165_s27, %s364_s28  }
  0x5a   : > { %s385_s9 = scalar_lea.vmem [#allocation7], %s2153_s24  ;;  %s382_s13 = scalar_lea.sflag [#allocation8], %s381_s11 }
  0x5b   : > { %s392_s15 = sshll.u32 %s385_s9, 4  ;;  %s1827_s12 = scalar_lea.hbm %s2176_s30, 64  ;;  %s393_s15 = int_to_ptr.vmem [resolvable:$true] %s392_s15 }
  0x5c   : > { %p1828_p7 = scmp.ne.s32.totalorder %s2176_s30, %s1827_s12  ;;  %s1832_s29 = scalar_lea.hbm %s2474_s2, 128 }
  0x5d   : > { %p1833_p8 = scmp.lt.u32.totalorder %s2176_s30, %s2474_s2  ;;  %p1834_p11 = scmp.lt.u32.totalorder %s1832_s29, %s1827_s12 }
  0x5e   : > { %p1830_p4 = pnand %p1828_p7, %p1799_p3  ;;  %p1836_p0 = scmp.lt.u32.totalorder %s1827_s12, %s2176_s30 }
  0x5f   : > { %p1835_p12 = por %p1834_p11, %p1833_p8 }
  0x60   : > { %p1831_p6 = pneg %p1830_p4 }
  0x61   : > { %p1837_p5 = por %p1836_p0, %p1835_p12 }
  0x63   : > { %p1838_p9 = pnand %p1837_p5, %p1831_p6 }
  0x65   : > { %1841 = shalt.err (!%p1838_p9)
}
  0x66   : > { %s1842_s5 = scalar_lea.vmem %s393_s15, 64  ;;  %s1985_s27 = smov [#allocation7]  }
  0x67   : > { %p1843_p1 = scmp.ne.s32.totalorder %s393_s15, %s1842_s5  ;;  %s1847_s24 = sshll.u32 %s1985_s27, 4  ;;  %s1848_s24 = int_to_ptr.vmem [resolvable:$false] %s1847_s24 }
  0x68   : > { %s1849_s28 = scalar_lea.vmem %s1848_s24, 128  ;;  %p1850_p4 = scmp.lt.s32.totalorder %s393_s15, %s1848_s24 }
  0x69   : > { %p1845_p2 = pnand %p1843_p1, %p1799_p3  ;;  %p1851_p10 = scmp.lt.s32.totalorder %s1849_s28, %s1842_s5 }
  0x6b   : > { %p1846_p7 = pneg %p1845_p2  ;;  %p1852_p8 = por %p1851_p10, %p1850_p4 }
  0x6d   : > { %p1853_p11 = pnand %p1852_p8, %p1846_p7 }
  0x6f   : > { %1856 = shalt.err (!%p1853_p11)
}
  0x70   : > { %1662 = dma.hbm_to_vmem [thread:$0]  (!%p2169_p13), %s2176_s30, 64, %s393_s15, %s382_s13  }
  0x71   : > { %p2511_p6 = scmp.ne.s32.totalorder %s2502_s23, 0 }
  0x72   : > { %s2229_s11 = sand.u32 (!%p2511_p6), 1, %s1963_s14   ;;  %p2512_p3 = scmp.ne.s32.totalorder (!%p2511_p6), %s2499_s21, 0 }
  0x73   : > { %401 = sbr.rel (%p2511_p6) target bundleno = 1902 (0x76e), region = 56  ;;  %s1479_s9 = sshll.u32 (!%p2511_p6), %s2229_s11, 2 }
  0x74   : > { %s404_s12 = scalar_lea.sflag (!%p2511_p6), [#allocation5], %s2229_s11  ;;  %s407_s17 = scalar_lea.vmem (!%p2511_p6), [#allocation4], %s1479_s9 }
  0x7a   : > { %1938 = dma.done.wait (%p2512_p3), %s404_s12, 64  }
  0x7b   : > { %1940 = vsyncadd (%p2512_p3), %s404_s12, 4294967232  ;;  %s412_s20 = sand.u32 1, %s2084_s19   ;;  %s2238_s23 = scalar_lea.vmem [#allocation7], %s1479_s9 }
  0x7c   : > { %s413_s30 = scalar_lea.sflag [#allocation8], %s412_s20 }
  0x7d   : > { %1942 = dma.done.wait (%p2512_p3), %s413_s30, 64  }
  0x7e   : > { %1944 = vsyncadd (%p2512_p3), %s413_s30, 4294967232  ;;  %p2513_p10 = scmp.eq.s32.totalorder %s2084_s19, 0 }
  0x80   : > { %1946 = dma.done.wait (%p2513_p10), [#allocation8], 256   ;;  %p2514_p13 = pmov %p2513_p10 }
  0x81   : > { %v1986_v0 = vmov 0.0   ;;  %vm1987_vm0 = vmmov 0   ;;  %p474_p12 = scmp.lt.s32.totalorder %s1971_s16, 1  ;;  %v1735_v1 = vld [vmem:[%s2476_s4] sm:$0xff]   ;;  %v1736_v2 = vld [vmem:[%s2476_s4 + $0x8] sm:$0xff]   ;;  %vm504_vm1 = vcmask 261120  }
  0x82   : > { %1948 = vsyncadd (%p2514_p13), [#allocation8], 4294967040  ;;  %1556 = vmatprep.subr.bf16.mxu0 %v1986_v0  ;;  %1560 = vmatprep.mubr.msk.bf16.mxu0 %vm1987_vm0, %v1986_v0  ;;  %v486_v3 = vld [vmem:[%s407_s17] sm:$0xf]  ;;  %v1737_v4 = vld [vmem:[%s2475_s3] sm:$0xff]   ;;  %vm549_vm2 = vcmask 519168  }
  0x83   : > { %1564 = vmatprep.subr.bf16.mxu1 %v1986_v0  ;;  %1568 = vmatprep.mubr.msk.bf16.mxu1 %vm1987_vm0, %v1986_v0  ;;  %s475_s19 = scalar_select %p474_p12, %s1971_s16, 1  ;;  %v1739_v5 = vld [vmem:[#allocation9] sm:$0xff]   ;;  %v1738_v6 = vld [vmem:[%s2475_s3 + $0x8] sm:$0xff]   ;;  %v1740_v9 = vld [vmem:[#allocation9 + $0x8] sm:$0xff]   ;;  %vm677_vm3 = vcmask 130048   ;;  %vm743_vm4 = vcmask 1043456  }
  0x84   : > { %1557 = vmatpush3.bf16.msra.mxu0 %v1735_v1  ;;  %1565 = vmatpush3.bf16.msra.mxu1 %v1739_v5  ;;  %v487_v10 = vld [vmem:[%s2238_s23] sm:$0xf]  ;;  %s1988_s12 = smov 96   ;;  %s1989_s17 = smov 112   ;;  %vm724_vm5 = vcmask 64512   ;;  %vm737_vm6 = vcmask 60416  }
  0x85   : > { %1558 = vmatprep.subr.bf16.mxu0 %v1986_v0  ;;  %s1484_s8 = sshll.u32 %s475_s19, 3  ;;  %1566 = vmatprep.subr.bf16.mxu1 %v1986_v0  ;;  %s1990_s20 = smov 80   ;;  %vm1162_vm7 = vcmask 392192   ;;  %vm1197_vm8 = vcmask 523264  }
  0x86   : > { %s480_s24 = scalar_lea.vmem %s2472_s0, %s1484_s8  ;;  %s1483_s30 = sshll.u32 %s2229_s11, 4 }
  0x87   : > { %v2277_v7 = vld [vmem:[%s480_s24] sm:$0xff]  ;;  %s2334_s23 = scalar_lea.vmem [#allocation11], %s1483_s30  ;;  %s1991_s22 = smov 16  }
  0x88   : > { %1559 = vmatpush3.bf16.msra.mxu0 %v1736_v2  ;;  %v613_v8 = vpack.c.bf16 %v2277_v7, %v2277_v7  ;;  %1567 = vmatpush3.bf16.msra.mxu1 %v1740_v9  ;;  %s1992_s27 = smov 32   ;;  %s1993_s24 = smov 48  }
  0x89   : > { %1572 = vmatprep.subr.bf16.mxu0 %v1986_v0  ;;  %1580 = vmatprep.subr.bf16.mxu1 %v1986_v0  ;;  %s1525_s28 = sshll.u32 %s1971_s16, 8  ;;  %s1306_s9 = sshll.u32 %s2334_s23, 4  ;;  %s2385_s9 = int_to_ptr.vmem [resolvable:$true] %s1306_s9 }
  0x8a   : > { %s1278_s30 = scalar_lea.sflag [#allocation12], %s2229_s11  ;;  %s1857_s21 = scalar_lea.vmem %s2385_s9, 256 }
  0x8b   : > { %1561 = vmatmul.mubr.msk.bf16.vlgmr.msra.gmra.mrb[0].mxu0 %vm504_vm1, %v486_v3  ;;  %1569 = vmatmul.mubr.msk.bf16.vlgmr.msra.gmra.mrb[0].mxu1 %vm504_vm1, %v487_v10  ;;  %p1858_p0 = scmp.ne.s32.totalorder %s2385_s9, %s1857_s21  ;;  %p2515_p5 = scmp.ne.s32.totalorder %s2508_s26, 0 }
  0x8c   : > { %1573 = vmatpush3.bf16.msra.mxu0 %v1737_v4  ;;  %1576 = vmatprep.mubr.msk.bf16.mxu0 %vm1987_vm0, %v1986_v0  ;;  %s1994_s15 = smov [#allocation11]  }
  0x8d   : > { %1574 = vmatprep.subr.bf16.mxu0 %v1986_v0  ;;  %1582 = vmatprep.mubr.msk.bf16.mxu1 %vm1987_vm0, %v1986_v0  ;;  %p1859_p9 = pnand %p1858_p0, %p2515_p5  ;;  %s1861_s19 = sshll.u32 %s1994_s15, 4  ;;  %s1862_s19 = int_to_ptr.vmem [resolvable:$false] %s1861_s19 }
  0x8e   : > { %p1864_p2 = scmp.lt.s32.totalorder %s2385_s9, %s1862_s19 }
  0x8f   : > { %p1860_p1 = pneg %p1859_p9 }
  0x90   : > { %1575 = vmatpush3.bf16.msra.mxu0 %v1738_v6 }
  0x91   : > { %1586 = vmatprep.subr.bf16.mxu0 %v1986_v0 }
  0x93   : > { %1577 = vmatmul.mubr.msk.bf16.vlgmr.msra.gmra.mrb[4].mxu0 %vm504_vm1, %v613_v8 }
  0x94   : > { %1588 = vmatprep.mubr.msk.bf16.mxu0 %vm1987_vm0, %v1986_v0 }
 0x15e   : > { %v542_v11 = vpop.f32.mrb[0].mxu0  ;;  %v604_v27 = vpop.f32.mrb[0].mxu1 }
 0x15f   : > { %v548_v12 = vpack.c.bf16 %v542_v11, %v542_v11  ;;  %v1562_v13 = vpop.f32.mrb[1].mxu0  ;;  %v610_v28 = vpack.c.bf16 %v604_v27, %v604_v27  ;;  %v1570_v29 = vpop.f32.mrb[1].mxu1 }
 0x160   : > { %v545_v14 = vpop.f32.mrb[2].mxu0  ;;  %v607_v30 = vpop.f32.mrb[2].mxu1 }
 0x161   : > { %550 = vst.msk [vmem:[#allocation2] sm:$0xf] %vm549_vm2, %v548_v12  ;;  %v1563_v15 = vpop.f32.mrb[3].mxu0  ;;  %611 = vst.msk [vmem:[#allocation3] sm:$0xf] %vm549_vm2, %v610_v28  ;;  %v1571_v31 = vpop.f32.mrb[3].mxu1 }
 0x166   : > { %v668_v16 = vpop.f32.mrb[4].mxu0 }
 0x167   : > { %v674_v17 = vmul.f32 0.25, %v668_v16  ;;  %v1578_v18 = vpop.f32.mrb[5].mxu0 }
 0x168   : > { %v676_v19 = vld [vmem:[#allocation2] sm:$0xf]  ;;  %v671_v23 = vpop.f32.mrb[6].mxu0  ;;  %v739_v32 = vld [vmem:[#allocation3] sm:$0xf] }
 0x169   : > { %v1741_v20 = vld [vmem:[#allocation2] ss:$0 sps:$4 sm:$0xff]   ;;  %v682_v21 = vsel %vm677_vm3, %v676_v19, 0  ;;  %v675_v24 = vpack.c.bf16 %v674_v17, %v674_v17  ;;  %v1579_v25 = vpop.f32.mrb[7].mxu0  ;;  %v745_v33 = vsel %vm743_vm4, %v739_v32, 0 }
 0x16a   : > { %v1742_v22 = vld [vmem:[#allocation2] ss:$0 sps:$4 sm:$0xff]   ;;  %1581 = vmatpush3.bf16.xpose.msra.mxu1 %v682_v21  ;;  %914 = vrot.lane.b32.xlu1 %v1741_v20, %s1988_s12  ;;  %v1744_v5 = vld [vmem:[#allocation3] ss:$0 sps:$4 sm:$0xff]  }
 0x16b   : > { %794 = vrot.lane.b32.xlu0 %v1742_v22, %s1989_s17  ;;  %1592 = vmatprep.subr.bf16.mxu1 %v1986_v0  ;;  %v1743_v26 = vld [vmem:[#allocation2] ss:$0 sps:$4 sm:$0xff]   ;;  %v1745_v22 = vld [vmem:[#allocation3] ss:$0 sps:$4 sm:$0xff]  }
 0x16c   : > { %1587 = vmatpush3.bf16.msra.mxu0 %v745_v33 }
 0x16d   : > { %1598 = vmatprep.subr.bf16.mxu0 %v1986_v0 }
 0x16e   : > { %909 = vrot.lane.b32.xlu1 %v675_v24, %s1988_s12 }
 0x16f   : > { %789 = vrot.lane.b32.xlu0 %v675_v24, %s1989_s17 }
 0x171   : > { %1583 = vmatmul.mubr.msk.bf16.vlgmr.msra.gmra.mrb[4].mxu1 %vm677_vm3, %v675_v24 }
 0x172   : > { %1029 = vrot.lane.b32.xlu1 %v675_v24, %s1990_s20  ;;  %1594 = vmatprep.mubr.msk.bf16.mxu1 %vm1987_vm0, %v1986_v0 }
 0x173   : > { %1034 = vrot.lane.b32.xlu0 %v1743_v26, %s1990_s20  ;;  %v1746_v26 = vld [vmem:[#allocation3] ss:$0 sps:$4 sm:$0xff]  }
 0x1dc   : > { %v915_v36 = vpop.permute.xlu1 %914 }
 0x1dd   : > { %v795_v34 = vpop.permute.xlu0 %794  ;;  %v920_v38 = vsel %vm677_vm3, %v915_v36, 0 }
 0x1de   : > { %v800_v35 = vsel %vm677_vm3, %v795_v34, 0 }
 0x1df   : > { %1593 = vmatpush3.bf16.xpose.msra.mxu1 %v800_v35 }
 0x1e0   : > { %1604 = vmatprep.subr.bf16.mxu1 %v1986_v0  ;;  %v910_v40 = vpop.permute.xlu1 %909 }
 0x1e1   : > { %v790_v37 = vpop.permute.xlu0 %789 }
 0x1e4   : > { %v1030_v42 = vpop.permute.xlu1 %1029 }
 0x1e5   : > { %v1035_v39 = vpop.permute.xlu0 %1034 }
 0x1e6   : > { %1595 = vmatmul.mubr.msk.bf16.vlgmr.msra.gmra.mrb[8].mxu1 %vm677_vm3, %v790_v37  ;;  %v1040_v41 = vsel %vm677_vm3, %v1035_v39, 0 }
 0x1e7   : > { %1605 = vmatpush3.bf16.xpose.msra.mxu1 %v920_v38  ;;  %1606 = vmatprep.mubr.msk.bf16.mxu1 %vm1987_vm0, %v1986_v0 }
 0x1e8   : > { %1616 = vmatprep.subr.bf16.mxu1 %v1986_v0 }
 0x1ee   : > { %1607 = vmatmul.mubr.msk.bf16.vlgmr.msra.gmra.mrb[12].mxu1 %vm677_vm3, %v910_v40 }
 0x1ef   : > { %1617 = vmatpush3.bf16.xpose.msra.mxu1 %v1040_v41  ;;  %1618 = vmatprep.mubr.msk.bf16.mxu1 %vm1987_vm0, %v1986_v0 }
 0x1f0   : > { %1628 = vmatprep.subr.bf16.mxu1 %v1986_v0 }
 0x1f6   : > { %1619 = vmatmul.mubr.msk.bf16.vlgmr.msra.gmra.mrb[16].mxu1 %vm677_vm3, %v1030_v42 }
 0x1f7   : > { %1636 = vmatprep.mubr.msk.bf16.mxu1 %vm1987_vm0, %v1986_v0 }
 0x244   : > { %v718_v43 = vpop.f32.mrb[4].mxu1 }
 0x245   : > { %v1584_v44 = vpop.f32.mrb[5].mxu1  ;;  %v725_v45 = vsel %vm724_vm5, %v718_v43, -inf }
 0x246   : > { %726 = vmax.xlane.f32.xlu0 %v725_v45  ;;  %v721_v46 = vpop.f32.mrb[6].mxu1 }
 0x247   : > { %v1585_v47 = vpop.f32.mrb[7].mxu1 }
 0x2b9   : > { %v836_v48 = vpop.f32.mrb[8].mxu1 }
 0x2ba   : > { %v1596_v49 = vpop.f32.mrb[9].mxu1  ;;  %v842_v50 = vsel %vm724_vm5, %v836_v48, -inf }
 0x2bb   : > { %843 = vmax.xlane.f32.xlu1 %v842_v50  ;;  %v839_v51 = vpop.f32.mrb[10].mxu1  ;;  %v1747_v50 = vld [vmem:[%s2478_s6] sm:$0xff]  }
 0x2bc   : > { %v1597_v52 = vpop.f32.mrb[11].mxu1  ;;  %1629 = vmatpush3.bf16.msra.mxu1 %v1747_v50  ;;  %v1748_v51 = vld [vmem:[%s2478_s6 + $0x8] sm:$0xff]  }
 0x2bd   : > { %1630 = vmatprep.subr.bf16.mxu1 %v1986_v0  ;;  %v1749_v52 = vld [vmem:[%s2478_s6 + $0x10] sm:$0xff]  }
 0x2c0   : > { %1631 = vmatpush3.bf16.msra.mxu1 %v1748_v51 }
 0x2c1   : > { %v956_v53 = vpop.f32.mrb[12].mxu1  ;;  %1632 = vmatprep.subr.bf16.mxu1 %v1986_v0 }
 0x2c2   : > { %v1608_v54 = vpop.f32.mrb[13].mxu1  ;;  %v962_v55 = vsel %vm724_vm5, %v956_v53, -inf }
 0x2c3   : > { %963 = vmax.xlane.f32.xlu0 %v962_v55  ;;  %v959_v56 = vpop.f32.mrb[14].mxu1 }
 0x2c4   : > { %v1609_v57 = vpop.f32.mrb[15].mxu1  ;;  %1633 = vmatpush3.bf16.msra.mxu1 %v1749_v52 }
 0x2c5   : > { %1634 = vmatprep.subr.bf16.mxu1 %v1986_v0  ;;  %v1750_v57 = vld [vmem:[%s2478_s6 + $0x18] sm:$0xff]  }
 0x2c8   : > { %1635 = vmatpush3.bf16.msra.mxu1 %v1750_v57 }
 0x2c9   : > { %v1076_v58 = vpop.f32.mrb[16].mxu1 }
 0x2ca   : > { %v1620_v59 = vpop.f32.mrb[17].mxu1  ;;  %v1082_v60 = vsel %vm724_vm5, %v1076_v58, -inf }
 0x2cb   : > { %1083 = vmax.xlane.f32.xlu0 %v1082_v60  ;;  %v1079_v61 = vpop.f32.mrb[18].mxu1 }
 0x2cc   : > { %v1621_v62 = vpop.f32.mrb[19].mxu1 }
 0x2d3   : > { %v727_v63 = vpop.xlane.xlu0 %726 }
 0x2d4   : > { %v728_v1 = vsub.f32 %v718_v43, %v727_v63 }
 0x2d6   : > { %v729_v2 = vmul.f32 1.442695, %v728_v1 }
 0x2d8   : > { %1751 = vpow2.f32 %v729_v2 }
 0x2e2   : > { %v1752_v3 = vpop.eup %1751 }
 0x2e3   : > { %v731_v4 = vsel %vm724_vm5, %v1752_v3, 0.0 }
 0x2e4   : > { %732 = vadd.xlane.f32.xlu1 %v731_v4 }
 0x2f5   : > { %860 = vrot.lane.b32.xlu1 %v1744_v5, %s1989_s17 }
 0x348   : > { %v844_v6 = vpop.xlane.xlu1 %843 }
 0x349   : > { %v845_v8 = vsub.f32 %v836_v48, %v844_v6 }
 0x34b   : > { %v846_v9 = vmul.f32 1.442695, %v845_v8 }
 0x34d   : > { %1753 = vpow2.f32 %v846_v9 }
 0x350   : > { %v964_v10 = vpop.xlane.xlu0 %963 }
 0x351   : > { %v965_v11 = vsub.f32 %v956_v53, %v964_v10 }
 0x353   : > { %v966_v12 = vmul.f32 1.442695, %v965_v11 }
 0x355   : > { %1755 = vpow2.f32 %v966_v12 }
 0x357   : > { %v1754_v13 = vpop.eup %1753 }
 0x358   : > { %v1084_v14 = vpop.xlane.xlu0 %1083  ;;  %v848_v15 = vsel %vm724_vm5, %v1754_v13, 0.0 }
 0x359   : > { %v1085_v16 = vsub.f32 %v1076_v58, %v1084_v14  ;;  %849 = vadd.xlane.f32.xlu0 %v848_v15 }
 0x35b   : > { %v1086_v17 = vmul.f32 1.442695, %v1085_v16 }
 0x35d   : > { %1757 = vpow2.f32 %v1086_v17 }
 0x35f   : > { %v1756_v18 = vpop.eup %1755 }
 0x360   : > { %v968_v19 = vsel %vm724_vm5, %v1756_v18, 0.0 }
 0x361   : > { %969 = vadd.xlane.f32.xlu1 %v968_v19 }
 0x367   : > { %v1758_v20 = vpop.eup %1757 }
 0x368   : > { %v1088_v21 = vsel %vm724_vm5, %v1758_v20, 0.0 }
 0x369   : > { %1089 = vadd.xlane.f32.xlu0 %v1088_v21 }
 0x371   : > { %v733_v23 = vpop.xlane.xlu1 %732 }
 0x372   : > { %1759 = vrcp.f32 %v733_v23  ;;  %1100 = vrot.lane.b32.xlu1 %v1745_v22, %s1990_s20  ;;  %s2383_s20 = scalar_lea.hbm %s2482_s10, %s1525_s28 }
 0x375   : > { %v861_v27 = vpop.permute.xlu1 %860 }
 0x376   : > { %v866_v29 = vsel %vm743_vm4, %v861_v27, 0 }
 0x37c   : > { %v1760_v24 = vpop.eup %1759 }
 0x37d   : > { %v735_v25 = vmul.f32 %v1760_v24, %v1752_v3 }
 0x37f   : > { %980 = vrot.lane.b32.xlu0 %v1746_v26, %s1988_s12  ;;  %v736_v28 = vpack.c.bf16 %v735_v25, %v735_v25 }
 0x381   : > { %738 = vst.msk [vmem:[%s2334_s23] sm:$0xf] %vm737_vm6, %v736_v28  ;;  %1589 = vmatmul.mubr.msk.bf16.vlgmr.msra.gmra.mrb[8].mxu0 %vm724_vm5, %v736_v28 }
 0x382   : > { %1599 = vmatpush3.bf16.msra.mxu0 %v866_v29  ;;  %1600 = vmatprep.mubr.msk.bf16.mxu0 %vm1987_vm0, %v1986_v0 }
 0x383   : > { %1610 = vmatprep.subr.bf16.mxu0 %v1986_v0 }
 0x3e6   : > { %v850_v30 = vpop.xlane.xlu0 %849 }
 0x3e7   : > { %1761 = vrcp.f32 %v850_v30 }
 0x3ee   : > { %v970_v31 = vpop.xlane.xlu1 %969 }
 0x3ef   : > { %1763 = vrcp.f32 %v970_v31 }
 0x3f1   : > { %v1762_v32 = vpop.eup %1761 }
 0x3f2   : > { %v852_v33 = vmul.f32 %v1762_v32, %v1754_v13  ;;  %v1101_v40 = vpop.permute.xlu1 %1100 }
 0x3f3   : > { %v1106_v42 = vsel %vm743_vm4, %v1101_v40, 0 }
 0x3f4   : > { %v853_v34 = vpack.c.bf16 %v852_v33, %v852_v33 }
 0x3f6   : > { %1498 = vst.msk [vmem:[%s2334_s23 + $0x4] sm:$0xf] %vm737_vm6, %v853_v34  ;;  %1601 = vmatmul.mubr.msk.bf16.vlgmr.msra.gmra.mrb[12].mxu0 %vm724_vm5, %v853_v34  ;;  %v1090_v35 = vpop.xlane.xlu0 %1089 }
 0x3f7   : > { %1765 = vrcp.f32 %v1090_v35  ;;  %1612 = vmatprep.mubr.msk.bf16.mxu0 %vm1987_vm0, %v1986_v0 }
 0x3f9   : > { %v1764_v36 = vpop.eup %1763 }
 0x3fa   : > { %v972_v37 = vmul.f32 %v1764_v36, %v1756_v18  ;;  %v981_v38 = vpop.permute.xlu0 %980 }
 0x3fb   : > { %v986_v39 = vsel %vm743_vm4, %v981_v38, 0 }
 0x3fc   : > { %1611 = vmatpush3.bf16.msra.mxu0 %v986_v39  ;;  %v973_v41 = vpack.c.bf16 %v972_v37, %v972_v37 }
 0x3fd   : > { %1622 = vmatprep.subr.bf16.mxu0 %v1986_v0 }
 0x3fe   : > { %1503 = vst.msk [vmem:[%s2334_s23 + $0x8] sm:$0xf] %vm737_vm6, %v973_v41 }
 0x3ff   : > { %1613 = vmatmul.mubr.msk.bf16.vlgmr.msra.gmra.mrb[16].mxu0 %vm724_vm5, %v973_v41 }
 0x400   : > { %1623 = vmatpush3.bf16.msra.mxu0 %v1106_v42  ;;  %1624 = vmatprep.mubr.msk.bf16.mxu0 %vm1987_vm0, %v1986_v0 }
 0x401   : > { %v1766_v43 = vpop.eup %1765 }
 0x402   : > { %v1092_v44 = vmul.f32 %v1766_v43, %v1758_v20 }
 0x404   : > { %v1093_v45 = vpack.c.bf16 %v1092_v44, %v1092_v44 }
 0x406   : > { %1508 = vst.msk [vmem:[%s2334_s23 + $0xc] sm:$0xf] %vm737_vm6, %v1093_v45  ;;  %s1863_s23 = scalar_lea.vmem %s1862_s19, 512 }
 0x407   : > { %1625 = vmatmul.mubr.msk.bf16.vlgmr.msra.gmra.mrb[20].mxu0 %vm724_vm5, %v1093_v45  ;;  %p1865_p7 = scmp.lt.s32.totalorder %s1863_s23, %s1857_s21 }
 0x409   : > { %p1866_p4 = por %p1865_p7, %p1864_p2 }
 0x40b   : > { %p1867_p8 = pnand %p1866_p4, %p1860_p1 }
 0x454   : > { %v781_v46 = vpop.f32.mrb[8].mxu0 }
 0x455   : > { %v1590_v47 = vpop.f32.mrb[9].mxu0 }
 0x456   : > { %v784_v48 = vpop.f32.mrb[10].mxu0 }
 0x457   : > { %v1591_v49 = vpop.f32.mrb[11].mxu0 }
 0x4c9   : > { %v902_v53 = vpop.f32.mrb[12].mxu0 }
 0x4ca   : > { %1149 = vrot.lane.b32.xlu1 %v902_v53, %s1991_s22  ;;  %v1602_v54 = vpop.f32.mrb[13].mxu0 }
 0x4cb   : > { %v905_v55 = vpop.f32.mrb[14].mxu0 }
 0x4cc   : > { %v1603_v56 = vpop.f32.mrb[15].mxu0 }
 0x4d2   : > { %v1022_v58 = vpop.f32.mrb[16].mxu0 }
 0x4d3   : > { %1153 = vrot.lane.b32.xlu0 %v1022_v58, %s1992_s27  ;;  %v1614_v59 = vpop.f32.mrb[17].mxu0 }
 0x4d4   : > { %v1025_v60 = vpop.f32.mrb[18].mxu0 }
 0x4d5   : > { %v1615_v61 = vpop.f32.mrb[19].mxu0 }
 0x4da   : > { %v1142_v62 = vpop.f32.mrb[20].mxu0 }
 0x4db   : > { %1157 = vrot.lane.b32.xlu1 %v1142_v62, %s1993_s24  ;;  %v1626_v63 = vpop.f32.mrb[21].mxu0 }
 0x4dc   : > { %v1145_v1 = vpop.f32.mrb[22].mxu0 }
 0x4dd   : > { %v1627_v2 = vpop.f32.mrb[23].mxu0 }
 0x53c   : > { %v1150_v3 = vpop.permute.xlu1 %1149 }
 0x53d   : > { %v1160_v0 = vsel %vm677_vm3, %v781_v46, %v1150_v3 }
 0x545   : > { %v1154_v4 = vpop.permute.xlu0 %1153 }
 0x546   : > { %v1161_v5 = vsel %vm504_vm1, %v1160_v0, %v1154_v4 }
 0x54d   : > { %v1158_v6 = vpop.permute.xlu1 %1157 }
 0x54e   : > { %v1163_v8 = vsel %vm1162_vm7, %v1161_v5, %v1158_v6 }
 0x54f   : > { %v1164_v9 = vpack.c.bf16 %v1163_v8, %v1163_v8 }
 0x551   : > { %1637 = vmatmul.mubr.msk.bf16.vlgmr.msra.gmra.mrb[20].mxu1 %vm1197_vm8, %v1164_v9 }
 0x624   : > { %v1235_v10 = vpop.f32.mrb[20].mxu1 }
 0x625   : > { %v1236_v11 = vadd.f32 %v1235_v10, %v2277_v7  ;;  %v1638_v12 = vpop.f32.mrb[21].mxu1 }
 0x626   : > { %v1238_v13 = vpop.f32.mrb[22].mxu1 }
 0x627   : > { %v1639_v14 = vpop.f32.mrb[23].mxu1  ;;  %v1241_v15 = vsel %vm504_vm1, %v1236_v11, 0.0 }
 0x628   : > { %1242 = vadd.xlane.f32.xlu0 %v1241_v15 }
 0x6b5   : > { %v1243_v16 = vpop.xlane.xlu0 %1242 }
 0x6b6   : > { %v1245_v17 = vmul.f32 0.03125, %v1243_v16 }
 0x6b8   : > { %v1246_v18 = vsub.f32 %v1236_v11, %v1245_v17 }
 0x6ba   : > { %v1247_v19 = vmul.f32 %v1246_v18, %v1246_v18 }
 0x6bc   : > { %v1248_v20 = vsel %vm504_vm1, %v1247_v19, 0.0 }
 0x6bd   : > { %1249 = vadd.xlane.f32.xlu1 %v1248_v20 }
 0x6be   : > { %1870 = shalt.err (!%p1867_p8)
}
 0x6bf   : > { %s1871_s13 = scalar_lea.hbm %s2383_s20, 256  ;;  %s1875_s22 = scalar_lea.hbm %s2482_s10, 512 }
 0x6c0   : > { %p1872_p11 = scmp.ne.s32.totalorder %s2383_s20, %s1871_s13  ;;  %p1876_p10 = scmp.lt.u32.totalorder %s2383_s20, %s2482_s10 }
 0x6c1   : > { %p1877_p13 = scmp.lt.u32.totalorder %s1875_s22, %s1871_s13  ;;  %p1879_p0 = scmp.lt.u32.totalorder %s1871_s13, %s2383_s20 }
 0x6c2   : > { %p1873_p6 = pnand %p1872_p11, %p2515_p5 }
 0x6c3   : > { %p1878_p12 = por %p1877_p13, %p1876_p10 }
 0x6c4   : > { %p1874_p3 = pneg %p1873_p6 }
 0x6c5   : > { %p1880_p9 = por %p1879_p0, %p1878_p12 }
 0x6c7   : > { %p1881_p1 = pnand %p1880_p9, %p1874_p3 }
 0x6c9   : > { %1884 = shalt.err (!%p1881_p1)
}
 0x6ca   : > { %s1995_s27 = smov 64   ;;  %s1996_s24 = smov 4   ;;  %v1516_v24 = vld [vmem:[%s2479_s7] ss:$0 sm:$0xff] }
 0x6cb   : > { %1649 = dma.vmem_to_hbm [thread:$0]  (%p2515_p5), %s2385_s9, 256, %s2383_s20, %s1278_s30, %s1995_s27, %s1995_s27, %s1996_s24  }
 0x6cc   : > { %s1482_s28 = sshll.u32 %s2229_s11, 3  ;;  %s2516_s19 = sld [smem:[#allocation25_spill]] }
 0x6cd   : > { %s1520_s23 = sshll.u32 %s1971_s16, 7  ;;  %s466_s13 = scalar_lea.vmem [#allocation10], %s1482_s28 }
 0x6ce   : > { %s1292_s9 = sshll.u32 %s466_s13, 4  ;;  %s2517_s25 = sld [smem:[#allocation26_spill]]  ;;  %s2424_s9 = int_to_ptr.vmem [resolvable:$true] %s1292_s9 }
 0x6cf   : > { %s1273_s22 = scalar_lea.sflag [#allocation6], %s2229_s11  ;;  %s1885_s8 = scalar_lea.vmem %s2424_s9, 128 }
 0x6d0   : > { %p1886_p2 = scmp.ne.s32.totalorder %s2424_s9, %s1885_s8  ;;  %s1997_s16 = smov [#allocation10]  }
 0x6d1   : > { %s1889_s5 = sshll.u32 %s1997_s16, 4  ;;  %s1890_s5 = int_to_ptr.vmem [resolvable:$false] %s1889_s5 }
 0x6d2   : > { %v1517_v26 = vld [vmem:[%s2516_s19] ss:$0 sm:$0xff]  ;;  %p1887_p7 = pnand %p1886_p2, %p2515_p5  ;;  %s1891_s27 = scalar_lea.vmem %s1890_s5, 256 }
 0x6d3   : > { %p1892_p8 = scmp.lt.s32.totalorder %s2424_s9, %s1890_s5  ;;  %p1893_p11 = scmp.lt.s32.totalorder %s1891_s27, %s1885_s8 }
 0x6d4   : > { %s2422_s29 = scalar_lea.hbm %s2517_s25, %s1520_s23  ;;  %p1888_p4 = pneg %p1887_p7 }
 0x6d5   : > { %p1894_p6 = por %p1893_p11, %p1892_p8 }
 0x6d7   : > { %p1895_p3 = pnand %p1894_p6, %p1888_p4 }
 0x74a   : > { %v1250_v7 = vpop.xlane.xlu1 %1249 }
 0x74b   : > { %v1251_v21 = vmul.f32 0.03125, %v1250_v7 }
 0x74d   : > { %v1252_v22 = vadd.f32 1e-06, %v1251_v21 }
 0x74f   : > { %1767 = vrsqrt.f32 %v1252_v22 }
 0x759   : > { %v1768_v23 = vpop.eup %1767 }
 0x75a   : > { %v1254_v25 = vmul.f32 %v1768_v23, %v1246_v18 }
 0x75c   : > { %v1262_v27 = vmul.f32 %v1516_v24, %v1254_v25 }
 0x75e   : > { %v1270_v28 = vadd.f32 %v1517_v26, %v1262_v27 }
 0x760   : > { %1271 = vst.msk [vmem:[%s466_s13] sm:$0xff] %vm504_vm1, %v1270_v28 }
 0x761   : > { %1898 = shalt.err (!%p1895_p3)
}
 0x762   : > { %s1899_s11 = scalar_lea.hbm %s2422_s29, 128  ;;  %s1903_s12 = scalar_lea.hbm %s2517_s25, 256 }
 0x763   : > { %p1900_p10 = scmp.ne.s32.totalorder %s2422_s29, %s1899_s11  ;;  %p1904_p0 = scmp.lt.u32.totalorder %s2422_s29, %s2517_s25 }
 0x764   : > { %p1905_p9 = scmp.lt.u32.totalorder %s1903_s12, %s1899_s11  ;;  %p1907_p2 = scmp.lt.u32.totalorder %s1899_s11, %s2422_s29 }
 0x765   : > { %p1901_p13 = pnand %p1900_p10, %p2515_p5 }
 0x766   : > { %p1906_p1 = por %p1905_p9, %p1904_p0 }
 0x767   : > { %p1902_p12 = pneg %p1901_p13 }
 0x768   : > { %p1908_p7 = por %p1907_p2, %p1906_p1 }
 0x76a   : > { %p1909_p4 = pnand %p1908_p7, %p1902_p12 }
 0x76c   : > { %1912 = shalt.err (!%p1909_p4)
}
 0x76d   : > { %1648 = dma.vmem_to_hbm [thread:$0]  (%p2515_p5), %s2424_s9, 128, %s2422_s29, %s1273_s22  }
 0x76e PF: > { %s2518_s15 = sld [smem:[#allocation18_spill]]  ;;  %s2519_s19 = sld [smem:[#allocation21_spill]] }
 0x76f   : > { %p2521_p11 = scmp.ge.s32.totalorder %s1979_s18, 2 }
 0x774   : > { %s1321_s23 = sand.u32 1, %s2518_s15   ;;  %p2520_p8 = scmp.ne.s32.totalorder %s2519_s19, 0 }
 0x775   : > { %s1322_s13 = scalar_lea.sflag [#allocation6], %s1321_s23 }
 0x776   : > { %p1664_p6 = pnand %p2521_p11, %p2520_p8 }
 0x778   : > { %1950 = dma.done.wait (!%p1664_p6), %s1322_s13, 128  }
 0x779   : > { %1952 = vsyncadd (!%p1664_p6), %s1322_s13, 4294967168  ;;  %s1331_s20 = scalar_lea.sflag [#allocation12], %s1321_s23 }
 0x77a   : > { %1954 = dma.done.wait (!%p1664_p6), %s1331_s20, 256  }
 0x77b   : > { %1956 = vsyncadd (!%p1664_p6), %s1331_s20, 4294967040  ;;  %s33_s18 = sadd.s32 1, %s1979_s18   ;;  %s2522_s26 = sld [smem:[#allocation19_spill]] }
 0x77c   : > { %p30_p3 = scmp.ge.s32.totalorder %s33_s18, 4   ;;  %s2523_s15 = sld [smem:[#allocation23_spill]] }
 0x77d   : > { %s2524_s16 = sld [smem:[#allocation20_spill]]  ;;  %s2525_s17 = sld [smem:[#allocation22_spill]] }
 0x77e   : > { %s2526_s13 = smov %s1963_s14  ;;  %32 = sbr.rel (!%p30_p3) target bundleno = 14 (0xe), region = 145 }
 0x781   : > { %s2527_s14 = smov %s2522_s26 }
 0x785   :  { %1336 = vsyncpa [#allocation5], 1 }
 0x786   :  { %1338 = vsyncpa [#allocation5 + $0x1], 1 }
 0x787   :  { %1339 = vsyncpa [#allocation8], 1 }
 0x788   :  { %1341 = vsyncpa [#allocation8 + $0x1], 1 }
 0x789   :  { %1342 = vsyncpa [#allocation6], 1 }
 0x78a   :  { %1344 = vsyncpa [#allocation6 + $0x1], 1 }
 0x78b   :  { %1345 = vsyncpa [#allocation12], 1 }
 0x78c   :  { %1347 = vsyncpa [#allocation12 + $0x1], 1 }

</bundles_post_ra>
